<compile_context>
chip_gen: v6e
topology: v6e:2x2x1
jax: 0.10.0
libtpu: 0.0.40
codegen_flags: <defaults>
</compile_context>

<pallas_src>
import math

import numpy as np
import jax
import jax.numpy as jnp
from jax import lax
from jax.experimental import pallas as pl
from jax.experimental.pallas import tpu as pltpu  # noqa: F401  (CompilerParams when scaling up)

# ----------------------------- model dims -----------------------------------
B, S = 2, 8            # batch, sequence
H, F, V = 32, 64, 128  # hidden, ffn, vocab (V = exactly one MXU lane tile)
BS = B * S
NEG_INF = -1e30
INV_SQRT_H = 1.0 / math.sqrt(H)

# Static (batch block-diagonal ∧ causal) visibility, built host-side once and
# closed over by the jitted wrapper → compile-time constant, zero per-call work.
_row = np.arange(BS)[:, None]
_col = np.arange(BS)[None, :]
STATIC_VISIBLE = jnp.asarray(((_row // S) == (_col // S)) & (_col <= _row),
                             dtype=jnp.int32)                       # (BS, BS)


# --------------------- fused causal-LM + loss kernel -------------------------
def fused_lm_kernel(ids_ref, lbl_ref, valid_ref, mask_ref, vis_ref,
                    embed_ref, wq_ref, wk_ref, wv_ref, wo_ref,
                    w1_ref, w2_ref, wlm_ref,
                    logits_ref, loss_ref):
    ids = ids_ref[...]                          # (BS, 1) int32
    lbl = lbl_ref[...]                          # (BS, 1) int32 (shifted, safe)
    key_keep = mask_ref[...] > 0                # (1, BS)  bool
    visible = (vis_ref[...] > 0) & key_keep     # (BS, BS) bool

    # ---- embedding lookup as one-hot @ embed on the MXU (V = 128) ----
    vocab_iota = lax.broadcasted_iota(jnp.int32, (BS, V), 1)
    one_hot = (vocab_iota == ids).astype(jnp.bfloat16)               # (BS, V)
    x = jnp.dot(one_hot, embed_ref[...],
                preferred_element_type=jnp.float32)                  # (BS, H) f32

    # ---- single-head causal self-attention (1/sqrt(H) folded into wq) ----
    x_bf = x.astype(jnp.bfloat16)
    q = jnp.dot(x_bf, wq_ref[...], preferred_element_type=jnp.float32)
    k = jnp.dot(x_bf, wk_ref[...], preferred_element_type=jnp.float32)
    v = jnp.dot(x_bf, wv_ref[...], preferred_element_type=jnp.float32)

    # q @ k^T without materializing the transpose.
    scores = lax.dot_general(q.astype(jnp.bfloat16), k.astype(jnp.bfloat16),
                             dimension_numbers=(((1,), (1,)), ((), ())),
                             preferred_element_type=jnp.float32)     # (BS, BS)

    scores = jnp.where(visible, scores, NEG_INF)
    m = jnp.max(scores, axis=-1, keepdims=True)
    e = jnp.where(visible, jnp.exp(scores - m), 0.0)   # fully-masked rows -> all 0
    denom = jnp.maximum(jnp.sum(e, axis=-1, keepdims=True), 1.0)
    p = e * pl.reciprocal(denom, approx=True)          # approx=False for parity tests

    attn = jnp.dot(p.astype(jnp.bfloat16), v.astype(jnp.bfloat16),
                   preferred_element_type=jnp.float32)
    x = x + jnp.dot(attn.astype(jnp.bfloat16), wo_ref[...],
                    preferred_element_type=jnp.float32)

    # ---- MLP (tanh-approx GELU; elementwise kept in f32) ----
    h = jnp.dot(x.astype(jnp.bfloat16), w1_ref[...],
                preferred_element_type=jnp.float32)
    h = 0.5 * h * (1.0 + jnp.tanh(0.7978845608028654 *
                                  (h + 0.044715 * h * h * h)))
    x = x + jnp.dot(h.astype(jnp.bfloat16), w2_ref[...],
                    preferred_element_type=jnp.float32)

    # ---- LM head: bf16 writeback, NLL from the f32 logits ----
    logits = jnp.dot(x.astype(jnp.bfloat16), wlm_ref[...],
                     preferred_element_type=jnp.float32)             # (BS, V) f32
    logits_ref[...] = logits.astype(jnp.bfloat16)

    lm = jnp.max(logits, axis=-1, keepdims=True)
    lse = lm + jnp.log(jnp.sum(jnp.exp(logits - lm), axis=-1, keepdims=True))
    picked = jnp.sum(jnp.where(vocab_iota == lbl, logits, 0.0),
                     axis=-1, keepdims=True)
    nll = lse - picked                                               # (BS, 1)

    # ---- fused masked-mean loss (scalar output; no wrapper reduction) ----
    w = valid_ref[...]                                               # (BS, 1) f32
    num = jnp.sum(nll * w, axis=0, keepdims=True)                    # (1, 1)
    den = jnp.maximum(jnp.sum(w, axis=0, keepdims=True), 1.0)        # (1, 1)
    loss_ref[...] = num / den


def run_fused_lm(ids_col, lbl_col, valid_col, mask_row, params):
    # Single gridless invocation: every operand is far below a VMEM tile budget,
    # so one fused step is strictly cheaper than any pipelined grid here.
    return pl.pallas_call(
        fused_lm_kernel,
        out_shape=(jax.ShapeDtypeStruct((BS, V), jnp.bfloat16),
                   jax.ShapeDtypeStruct((1, 1), jnp.float32)),
    )(ids_col, lbl_col, valid_col, mask_row, STATIC_VISIBLE,
      params["embed"], params["wq"], params["wk"], params["wv"], params["wo"],
      params["w1"], params["w2"], params["wlm"])


# ------------------------------ wrapper --------------------------------------
def init_params(key):
    ks = jax.random.split(key, 8)
    s = lambda k, shape, scale: (jax.random.normal(k, shape, jnp.float32) * scale
                                 ).astype(jnp.bfloat16)
    return {
        "embed": s(ks[0], (V, H), 0.02),
        # attention 1/sqrt(H) score scale folded into wq at init time:
        "wq": s(ks[1], (H, H), (1.0 / math.sqrt(H)) * INV_SQRT_H),
        "wk": s(ks[2], (H, H), 1.0 / math.sqrt(H)),
        "wv": s(ks[3], (H, H), 1.0 / math.sqrt(H)),
        "wo": s(ks[4], (H, H), 1.0 / math.sqrt(H)),
        "w1": s(ks[5], (H, F), 1.0 / math.sqrt(H)),
        "w2": s(ks[6], (F, H), 1.0 / math.sqrt(F)),
        "wlm": s(ks[7], (H, V), 1.0 / math.sqrt(H)),
    }


@jax.jit
def base_expert_model_forward(params, input_ids, attention_mask, labels):
    """Mirrors BaseExpertModel.forward -> CausalLMOutput(loss, logits)."""
    ids_col = input_ids.reshape(BS, 1).astype(jnp.int32)
    mask_row = attention_mask.reshape(1, BS).astype(jnp.int32)

    # HF causal-LM shift done on the small (B,S) integer arrays only:
    # position t is scored against labels[t+1]; last position is masked out.
    shifted_labels = jnp.concatenate(
        [labels[:, 1:], jnp.zeros((B, 1), labels.dtype)], axis=1).astype(jnp.int32)
    valid = jnp.concatenate(
        [attention_mask[:, 1:], jnp.zeros((B, 1), attention_mask.dtype)],
        axis=1).astype(jnp.float32)
    valid = valid * (shifted_labels >= 0).astype(jnp.float32)
    safe_labels = jnp.where(shifted_labels >= 0, shifted_labels, 0)

    logits_flat, loss11 = run_fused_lm(
        ids_col, safe_labels.reshape(BS, 1), valid.reshape(BS, 1),
        mask_row, params)

    return {"loss": loss11[0, 0], "logits": logits_flat.reshape(B, S, V)}


# TODO(synk): checkpoint I/O (save_pretrained / from_pretrained / state-dict
# pruning) and generate() have no Pallas equivalent; only forward compute is
# implemented.

if __name__ == "__main__":
    key = jax.random.PRNGKey(0)
    kp, ki, km = jax.random.split(key, 3)

    params = init_params(kp)
    input_ids = jax.random.randint(ki, (B, S), 0, V, dtype=jnp.int32)
    attention_mask = jnp.concatenate(
        [jnp.ones((B, S - 2), jnp.int32), jnp.zeros((B, 2), jnp.int32)], axis=1)
    labels = input_ids  # standard causal-LM labels

    out = base_expert_model_forward(params, input_ids, attention_mask, labels)
    jax.block_until_ready(out)

    assert out["logits"].shape == (B, S, V)
    assert bool(jnp.isfinite(out["loss"]))
    print("KERNEL_OK")
</pallas_src>

<mosaic_0001>
module attributes {stable_mosaic.version = 11 : i64} {
  func.func @fused_lm_kernel(%arg0: memref<16x1xi32, #tpu.memory_space<vmem>>, %arg1: memref<16x1xi32, #tpu.memory_space<vmem>>, %arg2: memref<16x1xf32, #tpu.memory_space<vmem>>, %arg3: memref<1x16xi32, #tpu.memory_space<vmem>>, %arg4: memref<16x16xi32, #tpu.memory_space<vmem>>, %arg5: memref<128x32xbf16, #tpu.memory_space<vmem>>, %arg6: memref<32x32xbf16, #tpu.memory_space<vmem>>, %arg7: memref<32x32xbf16, #tpu.memory_space<vmem>>, %arg8: memref<32x32xbf16, #tpu.memory_space<vmem>>, %arg9: memref<32x32xbf16, #tpu.memory_space<vmem>>, %arg10: memref<32x64xbf16, #tpu.memory_space<vmem>>, %arg11: memref<64x32xbf16, #tpu.memory_space<vmem>>, %arg12: memref<32x128xbf16, #tpu.memory_space<vmem>>, %arg13: memref<16x128xbf16, #tpu.memory_space<vmem>>, %arg14: memref<1x1xf32, #tpu.memory_space<vmem>>) attributes {dimension_semantics = [], scalar_prefetch = 0 : i64, scratch_operands = 0 : i64, tpu.core_type = #tpu.core_type<tc>} {
    %c0 = arith.constant 0 : index
    %c0_0 = arith.constant 0 : index
    %0 = vector.load %arg0[%c0, %c0_0] : memref<16x1xi32, #tpu.memory_space<vmem>>, vector<16x1xi32>
    %c0_1 = arith.constant 0 : index
    %c0_2 = arith.constant 0 : index
    %1 = vector.load %arg1[%c0_1, %c0_2] : memref<16x1xi32, #tpu.memory_space<vmem>>, vector<16x1xi32>
    %c0_3 = arith.constant 0 : index
    %c0_4 = arith.constant 0 : index
    %2 = vector.load %arg3[%c0_3, %c0_4] : memref<1x16xi32, #tpu.memory_space<vmem>>, vector<1x16xi32>
    %c0_i32 = arith.constant 0 : i32
    %3 = vector.broadcast %c0_i32 : i32 to vector<1x16xi32>
    %4 = arith.cmpi sgt, %2, %3 : vector<1x16xi32>
    %c0_5 = arith.constant 0 : index
    %c0_6 = arith.constant 0 : index
    %5 = vector.load %arg4[%c0_5, %c0_6] : memref<16x16xi32, #tpu.memory_space<vmem>>, vector<16x16xi32>
    %c0_i32_7 = arith.constant 0 : i32
    %6 = vector.broadcast %c0_i32_7 : i32 to vector<16x16xi32>
    %7 = arith.cmpi sgt, %5, %6 : vector<16x16xi32>
    %8 = vector.broadcast %4 : vector<1x16xi1> to vector<16x16xi1>
    %9 = arith.andi %7, %8 : vector<16x16xi1>
    %10 = tpu.iota {dimensions = array<i32: 1>} : vector<16x128xi32>
    %11 = vector.broadcast %0 : vector<16x1xi32> to vector<16x128xi32>
    %12 = arith.cmpi eq, %10, %11 : vector<16x128xi32>
    %13 = arith.extui %12 : vector<16x128xi1> to vector<16x128xi32>
    %14 = arith.sitofp %13 : vector<16x128xi32> to vector<16x128xf32>
    %15 = arith.truncf %14 : vector<16x128xf32> to vector<16x128xbf16>
    %c0_8 = arith.constant 0 : index
    %c0_9 = arith.constant 0 : index
    %16 = vector.load %arg5[%c0_8, %c0_9] : memref<128x32xbf16, #tpu.memory_space<vmem>>, vector<128x32xbf16>
    %cst = arith.constant dense<0.000000e+00> : vector<16x32xf32>
    %17 = tpu.matmul %15, %16, %cst {dimension_numbers = #tpu.dot_dimension_numbers<[1], [0], [0], [1], [0, 0, 1, 1], [], []>} : vector<16x128xbf16>, vector<128x32xbf16>, vector<16x32xf32> -> vector<16x32xf32>
    %18 = arith.truncf %17 : vector<16x32xf32> to vector<16x32xbf16>
    %c0_10 = arith.constant 0 : index
    %c0_11 = arith.constant 0 : index
    %19 = vector.load %arg6[%c0_10, %c0_11] : memref<32x32xbf16, #tpu.memory_space<vmem>>, vector<32x32xbf16>
    %cst_12 = arith.constant dense<0.000000e+00> : vector<16x32xf32>
    %20 = tpu.matmul %18, %19, %cst_12 {dimension_numbers = #tpu.dot_dimension_numbers<[1], [0], [0], [1], [0, 0, 1, 1], [], []>} : vector<16x32xbf16>, vector<32x32xbf16>, vector<16x32xf32> -> vector<16x32xf32>
    %c0_13 = arith.constant 0 : index
    %c0_14 = arith.constant 0 : index
    %21 = vector.load %arg7[%c0_13, %c0_14] : memref<32x32xbf16, #tpu.memory_space<vmem>>, vector<32x32xbf16>
    %cst_15 = arith.constant dense<0.000000e+00> : vector<16x32xf32>
    %22 = tpu.matmul %18, %21, %cst_15 {dimension_numbers = #tpu.dot_dimension_numbers<[1], [0], [0], [1], [0, 0, 1, 1], [], []>} : vector<16x32xbf16>, vector<32x32xbf16>, vector<16x32xf32> -> vector<16x32xf32>
    %c0_16 = arith.constant 0 : index
    %c0_17 = arith.constant 0 : index
    %23 = vector.load %arg8[%c0_16, %c0_17] : memref<32x32xbf16, #tpu.memory_space<vmem>>, vector<32x32xbf16>
    %cst_18 = arith.constant dense<0.000000e+00> : vector<16x32xf32>
    %24 = tpu.matmul %18, %23, %cst_18 {dimension_numbers = #tpu.dot_dimension_numbers<[1], [0], [0], [1], [0, 0, 1, 1], [], []>} : vector<16x32xbf16>, vector<32x32xbf16>, vector<16x32xf32> -> vector<16x32xf32>
    %25 = arith.truncf %20 : vector<16x32xf32> to vector<16x32xbf16>
    %26 = arith.truncf %22 : vector<16x32xf32> to vector<16x32xbf16>
    %cst_19 = arith.constant dense<0.000000e+00> : vector<16x16xf32>
    %27 = tpu.matmul %25, %26, %cst_19 {dimension_numbers = #tpu.dot_dimension_numbers<[1], [1], [0], [0], [0, 0, 1, 0], [], []>} : vector<16x32xbf16>, vector<16x32xbf16>, vector<16x16xf32> -> vector<16x16xf32>
    %cst_20 = arith.constant -1.000000e+30 : f32
    %28 = vector.broadcast %cst_20 : f32 to vector<16x16xf32>
    %29 = arith.select %9, %27, %28 : vector<16x16xi1>, vector<16x16xf32>
    %cst_21 = arith.constant dense<0xFF800000> : vector<16xf32>
    %30 = vector.multi_reduction <maximumf>, %29, %cst_21 [1] : vector<16x16xf32> to vector<16xf32>
    %31 = vector.shape_cast %30 : vector<16xf32> to vector<16x1xf32>
    %32 = vector.broadcast %31 : vector<16x1xf32> to vector<16x16xf32>
    %33 = arith.subf %29, %32 : vector<16x16xf32>
    %34 = math.exp %33 : vector<16x16xf32>
    %cst_22 = arith.constant 0.000000e+00 : f32
    %35 = vector.broadcast %cst_22 : f32 to vector<16x16xf32>
    %36 = arith.select %9, %34, %35 : vector<16x16xi1>, vector<16x16xf32>
    %cst_23 = arith.constant dense<0.000000e+00> : vector<16xf32>
    %37 = vector.multi_reduction <add>, %36, %cst_23 [1] : vector<16x16xf32> to vector<16xf32>
    %38 = vector.shape_cast %37 : vector<16xf32> to vector<16x1xf32>
    %cst_24 = arith.constant 1.000000e+00 : f32
    %39 = vector.broadcast %cst_24 : f32 to vector<16x1xf32>
    %40 = arith.maximumf %38, %39 : vector<16x1xf32>
    %41 = tpu.reciprocal %40 {approx = true} : vector<16x1xf32> -> vector<16x1xf32>
    %42 = vector.broadcast %41 : vector<16x1xf32> to vector<16x16xf32>
    %43 = arith.mulf %36, %42 : vector<16x16xf32>
    %44 = arith.truncf %43 : vector<16x16xf32> to vector<16x16xbf16>
    %45 = arith.truncf %24 : vector<16x32xf32> to vector<16x32xbf16>
    %cst_25 = arith.constant dense<0.000000e+00> : vector<16x32xf32>
    %46 = tpu.matmul %44, %45, %cst_25 {dimension_numbers = #tpu.dot_dimension_numbers<[1], [0], [0], [1], [0, 0, 1, 1], [], []>} : vector<16x16xbf16>, vector<16x32xbf16>, vector<16x32xf32> -> vector<16x32xf32>
    %47 = arith.truncf %46 : vector<16x32xf32> to vector<16x32xbf16>
    %c0_26 = arith.constant 0 : index
    %c0_27 = arith.constant 0 : index
    %48 = vector.load %arg9[%c0_26, %c0_27] : memref<32x32xbf16, #tpu.memory_space<vmem>>, vector<32x32xbf16>
    %cst_28 = arith.constant dense<0.000000e+00> : vector<16x32xf32>
    %49 = tpu.matmul %47, %48, %cst_28 {dimension_numbers = #tpu.dot_dimension_numbers<[1], [0], [0], [1], [0, 0, 1, 1], [], []>} : vector<16x32xbf16>, vector<32x32xbf16>, vector<16x32xf32> -> vector<16x32xf32>
    %50 = arith.addf %17, %49 : vector<16x32xf32>
    %51 = arith.truncf %50 : vector<16x32xf32> to vector<16x32xbf16>
    %c0_29 = arith.constant 0 : index
    %c0_30 = arith.constant 0 : index
    %52 = vector.load %arg10[%c0_29, %c0_30] : memref<32x64xbf16, #tpu.memory_space<vmem>>, vector<32x64xbf16>
    %cst_31 = arith.constant dense<0.000000e+00> : vector<16x64xf32>
    %53 = tpu.matmul %51, %52, %cst_31 {dimension_numbers = #tpu.dot_dimension_numbers<[1], [0], [0], [1], [0, 0, 1, 1], [], []>} : vector<16x32xbf16>, vector<32x64xbf16>, vector<16x64xf32> -> vector<16x64xf32>
    %cst_32 = arith.constant 5.000000e-01 : f32
    %54 = vector.broadcast %cst_32 : f32 to vector<16x64xf32>
    %55 = arith.mulf %54, %53 : vector<16x64xf32>
    %cst_33 = arith.constant 4.471500e-02 : f32
    %56 = vector.broadcast %cst_33 : f32 to vector<16x64xf32>
    %57 = arith.mulf %56, %53 : vector<16x64xf32>
    %58 = arith.mulf %57, %53 : vector<16x64xf32>
    %59 = arith.mulf %58, %53 : vector<16x64xf32>
    %60 = arith.addf %53, %59 : vector<16x64xf32>
    %cst_34 = arith.constant 0.797884583 : f32
    %61 = vector.broadcast %cst_34 : f32 to vector<16x64xf32>
    %62 = arith.mulf %61, %60 : vector<16x64xf32>
    %63 = math.tanh %62 : vector<16x64xf32>
    %cst_35 = arith.constant 1.000000e+00 : f32
    %64 = vector.broadcast %cst_35 : f32 to vector<16x64xf32>
    %65 = arith.addf %64, %63 : vector<16x64xf32>
    %66 = arith.mulf %55, %65 : vector<16x64xf32>
    %67 = arith.truncf %66 : vector<16x64xf32> to vector<16x64xbf16>
    %c0_36 = arith.constant 0 : index
    %c0_37 = arith.constant 0 : index
    %68 = vector.load %arg11[%c0_36, %c0_37] : memref<64x32xbf16, #tpu.memory_space<vmem>>, vector<64x32xbf16>
    %cst_38 = arith.constant dense<0.000000e+00> : vector<16x32xf32>
    %69 = tpu.matmul %67, %68, %cst_38 {dimension_numbers = #tpu.dot_dimension_numbers<[1], [0], [0], [1], [0, 0, 1, 1], [], []>} : vector<16x64xbf16>, vector<64x32xbf16>, vector<16x32xf32> -> vector<16x32xf32>
    %70 = arith.addf %50, %69 : vector<16x32xf32>
    %71 = arith.truncf %70 : vector<16x32xf32> to vector<16x32xbf16>
    %c0_39 = arith.constant 0 : index
    %c0_40 = arith.constant 0 : index
    %72 = vector.load %arg12[%c0_39, %c0_40] : memref<32x128xbf16, #tpu.memory_space<vmem>>, vector<32x128xbf16>
    %cst_41 = arith.constant dense<0.000000e+00> : vector<16x128xf32>
    %73 = tpu.matmul %71, %72, %cst_41 {dimension_numbers = #tpu.dot_dimension_numbers<[1], [0], [0], [1], [0, 0, 1, 1], [], []>} : vector<16x32xbf16>, vector<32x128xbf16>, vector<16x128xf32> -> vector<16x128xf32>
    %74 = arith.truncf %73 : vector<16x128xf32> to vector<16x128xbf16>
    %c0_42 = arith.constant 0 : index
    %c0_43 = arith.constant 0 : index
    %75 = vector.load %arg13[%c0_42, %c0_43] : memref<16x128xbf16, #tpu.memory_space<vmem>>, vector<16x128xbf16>
    tpu.vector_store %arg13[%c0_42, %c0_43], %74 {strides = array<i32>} : memref<16x128xbf16, #tpu.memory_space<vmem>>, vector<16x128xbf16>,
    %cst_44 = arith.constant dense<0xFF800000> : vector<16xf32>
    %76 = vector.multi_reduction <maximumf>, %73, %cst_44 [1] : vector<16x128xf32> to vector<16xf32>
    %77 = vector.shape_cast %76 : vector<16xf32> to vector<16x1xf32>
    %78 = vector.broadcast %77 : vector<16x1xf32> to vector<16x128xf32>
    %79 = arith.subf %73, %78 : vector<16x128xf32>
    %80 = math.exp %79 : vector<16x128xf32>
    %cst_45 = arith.constant dense<0.000000e+00> : vector<16xf32>
    %81 = vector.multi_reduction <add>, %80, %cst_45 [1] : vector<16x128xf32> to vector<16xf32>
    %82 = vector.shape_cast %81 : vector<16xf32> to vector<16x1xf32>
    %83 = math.log %82 : vector<16x1xf32>
    %84 = arith.addf %77, %83 : vector<16x1xf32>
    %85 = vector.broadcast %1 : vector<16x1xi32> to vector<16x128xi32>
    %86 = arith.cmpi eq, %10, %85 : vector<16x128xi32>
    %cst_46 = arith.constant 0.000000e+00 : f32
    %87 = vector.broadcast %cst_46 : f32 to vector<16x128xf32>
    %88 = arith.select %86, %73, %87 : vector<16x128xi1>, vector<16x128xf32>
    %cst_47 = arith.constant dense<0.000000e+00> : vector<16xf32>
    %89 = vector.multi_reduction <add>, %88, %cst_47 [1] : vector<16x128xf32> to vector<16xf32>
    %90 = vector.shape_cast %89 : vector<16xf32> to vector<16x1xf32>
    %91 = arith.subf %84, %90 : vector<16x1xf32>
    %c0_48 = arith.constant 0 : index
    %c0_49 = arith.constant 0 : index
    %92 = vector.load %arg2[%c0_48, %c0_49] : memref<16x1xf32, #tpu.memory_space<vmem>>, vector<16x1xf32>
    %93 = arith.mulf %91, %92 : vector<16x1xf32>
    %cst_50 = arith.constant dense<0.000000e+00> : vector<1xf32>
    %94 = vector.multi_reduction <add>, %93, %cst_50 [0] : vector<16x1xf32> to vector<1xf32>
    %95 = vector.shape_cast %94 : vector<1xf32> to vector<1x1xf32>
    %cst_51 = arith.constant dense<0.000000e+00> : vector<1xf32>
    %96 = vector.multi_reduction <add>, %92, %cst_51 [0] : vector<16x1xf32> to vector<1xf32>
    %97 = vector.shape_cast %96 : vector<1xf32> to vector<1x1xf32>
    %cst_52 = arith.constant 1.000000e+00 : f32
    %98 = vector.broadcast %cst_52 : f32 to vector<1x1xf32>
    %99 = arith.maximumf %97, %98 : vector<1x1xf32>
    %100 = arith.divf %95, %99 : vector<1x1xf32>
    %c0_53 = arith.constant 0 : index
    %c0_54 = arith.constant 0 : index
    %101 = vector.load %arg14[%c0_53, %c0_54] : memref<1x1xf32, #tpu.memory_space<vmem>>, vector<1x1xf32>
    tpu.vector_store %arg14[%c0_53, %c0_54], %100 {strides = array<i32>} : memref<1x1xf32, #tpu.memory_space<vmem>>, vector<1x1xf32>,
    return
  }
}

</mosaic_0001>

<bundles_post_ra>
// kernel: base_expert_model_forward.1
= control target key start
LH: loop header
LB: loop body
LE: loop exit
PB: predicated region body
PF: predicated region fallthrough
CT: control target
= control target key end

     0   :  { %20 = vsyncpa [#allocation3], 0  ;;  %v1148_v1 = vmov 0   ;;  %v1149_v2 = vmov 0.0   ;;  %vm1150_vm0 = vmmov 0   ;;  %s1432_s0 = inlined_call_operand.vmem [shape: s32[16,1], index: 0, kind: input, shape index: {}]   ;;  %s1433_s1 = inlined_call_operand.vmem [shape: s32[16,1], index: 1, kind: input, shape index: {}]   ;;  %s1434_s2 = inlined_call_operand.vmem [shape: f32[16,1], index: 2, kind: input, shape index: {}]   ;;  %s1435_s3 = inlined_call_operand.vmem [shape: s32[1,16], index: 3, kind: input, shape index: {}]   ;;  %s1436_s4 = inlined_call_operand.vmem [shape: s32[16,16], index: 4, kind: input, shape index: {}]   ;;  %s1437_s5 = inlined_call_operand.vmem [shape: bf16[128,32], index: 5, kind: input, shape index: {}]   ;;  %s1438_s6 = inlined_call_operand.vmem [shape: bf16[32,32], index: 6, kind: input, shape index: {}]   ;;  %s1439_s7 = inlined_call_operand.vmem [shape: bf16[32,32], index: 7, kind: input, shape index: {}]   ;;  %s1440_s8 = inlined_call_operand.vmem [shape: bf16[32,32], index: 8, kind: input, shape index: {}]   ;;  %s1441_s9 = inlined_call_operand.vmem [shape: bf16[32,32], index: 9, kind: input, shape index: {}]   ;;  %s1442_s10 = inlined_call_operand.vmem [shape: bf16[32,64], index: 10, kind: input, shape index: {}]   ;;  %s1443_s11 = inlined_call_operand.vmem [shape: bf16[64,32], index: 11, kind: input, shape index: {}]   ;;  %s1444_s12 = inlined_call_operand.vmem [shape: bf16[32,128], index: 12, kind: input, shape index: {}]   ;;  %s1445_s13 = inlined_call_operand.hbm [shape: bf16[16,128], index: 13, kind: output, shape index: {0}]   ;;  %s1446_s14 = inlined_call_operand.hbm [shape: f32[1,1], index: 14, kind: output, shape index: {1}]  }
   0x1   :  { %v49_v0 = vld [vmem:[%s1432_s0] sm:$0xff]  ;;  %1056 = vset.pattern.permute.xlu0 %v1148_v1  ;;  %956 = vmatprep.subr.bf16.mxu0 %v1149_v2  ;;  %v1058_v3 = vld [vmem:[%s1437_s5 + $0x38] sm:$0xff]   ;;  %v50_v4 = vld [vmem:[%s1432_s0 + $0x8] sm:$0xff] }
   0x2   :  { %70 = vperm.xlu0 %1056, %v49_v0   ;;  %976 = vmatprep.subr.bf16.mxu1 %v1149_v2  ;;  %v1059_v5 = vld [vmem:[%s1437_s5 + $0x30] sm:$0xff]   ;;  %v1060_v6 = vld [vmem:[%s1437_s5 + $0x28] sm:$0xff]   ;;  %v1061_v7 = vld [vmem:[%s1437_s5 + $0x20] sm:$0xff]  }
   0x3   :  { %957 = vmatpush3.bf16.msra.mxu0 %v1058_v3  ;;  %1057 = vset.pattern.permute.xlu1 %v1148_v1  ;;  %v1062_v8 = vld [vmem:[%s1437_s5 + $0x18] sm:$0xff]   ;;  %v1063_v9 = vld [vmem:[%s1437_s5 + $0x10] sm:$0xff]  }
   0x4   :  { %958 = vmatprep.subr.bf16.mxu0 %v1149_v2  ;;  %972 = vmatprep.mubr.msk.bf16.mxu0 %vm1150_vm0, %v1149_v2 }
   0x5   :  { %980 = vmatprep.mubr.msk.bf16.mxu1 %vm1150_vm0, %v1149_v2 }
   0x6   :  { %73 = vperm.xlu0 %1056, %v50_v4  }
   0x7   :  { %959 = vmatpush3.bf16.msra.mxu0 %v1059_v5 }
   0x8   :  { %960 = vmatprep.subr.bf16.mxu0 %v1149_v2 }
   0xb   :  { %961 = vmatpush3.bf16.msra.mxu0 %v1060_v6 }
   0xc   :  { %962 = vmatprep.subr.bf16.mxu0 %v1149_v2 }
   0xf   :  { %963 = vmatpush3.bf16.msra.mxu0 %v1061_v7 }
  0x10   :  { %964 = vmatprep.subr.bf16.mxu0 %v1149_v2 }
  0x13   :  { %965 = vmatpush3.bf16.msra.mxu0 %v1062_v8 }
  0x14   :  { %21 = vsyncpa [#allocation5], 0  ;;  %966 = vmatprep.subr.bf16.mxu0 %v1149_v2  ;;  %v1064_v10 = vld [vmem:[%s1437_s5 + $0x8] sm:$0xff]   ;;  %v1065_v11 = vld [vmem:[%s1437_s5] sm:$0xff]   ;;  %v60_v12 = vlaneseq  ;;  %v1151_v16 = vmov 1.0|1.0  }
  0x15   :  { %v1066_v17 = vld [vmem:[%s1438_s6 + $0x8] sm:$0xff]   ;;  %v1067_v18 = vld [vmem:[%s1438_s6] sm:$0xff]   ;;  %vm204_vm4 = vcmask 261120   ;;  %vm414_vm9 = vcmask 130048   ;;  %vm662_vm12 = vcmask 523264  }
  0x16   :  { %v1277_v14 = vand.u32 127, %v60_v12  ;;  %977 = vmatpush3.bf16.msra.mxu1 %v1066_v17  ;;  %v1068_v22 = vld [vmem:[%s1439_s7 + $0x8] sm:$0xff]   ;;  %v1069_v25 = vld [vmem:[%s1439_s7] sm:$0xff]   ;;  %v61_v45 = vshrl.u32 %v60_v12, 7 }
  0x17   :  { %967 = vmatpush3.bf16.msra.mxu0 %v1063_v9  ;;  %978 = vmatprep.subr.bf16.mxu1 %v1149_v2  ;;  %v1070_v26 = vld [vmem:[%s1440_s8 + $0x8] sm:$0xff]   ;;  %v1071_v27 = vld [vmem:[%s1440_s8] sm:$0xff]  }
  0x18   :  { %968 = vmatprep.subr.bf16.mxu0 %v1149_v2  ;;  %v53_v44 = vld [vmem:[%s1435_s3] sm:$0x1]  ;;  %v62_v46 = vsub.s32 0, %v61_v45  ;;  %v56_v50 = vld [vmem:[%s1436_s4 + $0x8] sm:$0xff] }
  0x19   :  { %vm54_vm5 = vcmp.gt.s32.totalorder %v53_v44, 0  ;;  %v55_v49 = vld [vmem:[%s1436_s4] sm:$0xff]  ;;  %vm58_vm10 = vcmp.gt.s32.totalorder %v56_v50, 0 }
  0x1a   :  { %979 = vmatpush3.bf16.msra.mxu1 %v1067_v18  ;;  %v59_v47 = vsel %vm54_vm5, 1, %v1148_v1  ;;  %vm57_vm6 = vcmp.gt.s32.totalorder %v55_v49, 0 }
  0x1b   :  { %969 = vmatpush3.bf16.msra.mxu0 %v1064_v10  ;;  %984 = vmatprep.subr.bf16.mxu1 %v1149_v2  ;;  %v63_v48 = vrot.slane %v59_v47, %v62_v46 }
  0x1c   :  { %970 = vmatprep.subr.bf16.mxu0 %v1149_v2 }
  0x1d   :  { %vm64_vm7 = vcmp.eq.s32.totalorder %v63_v48, 1 }
  0x1e   :  { %vm1338_vm8 = vmand %vm57_vm6, %vm64_vm7 }
  0x1f   :  { %971 = vmatpush3.bf16.msra.mxu0 %v1065_v11  ;;  %vm1345_vm11 = vmand %vm58_vm10, %vm64_vm7 }
  0x20   :  { %1006 = vmatprep.subr.bf16.mxu0 %v1149_v2 }
  0x7d   :  { %v71_v13 = vpop.permute.xlu0 %70 }
  0x7e   :  { %vm75_vm1 = vcmp.eq.s32.totalorder %v1277_v14, %v71_v13 }
  0x81   :  { %v74_v15 = vpop.permute.xlu0 %73 }
  0x82   :  { %vm76_vm2 = vcmp.eq.s32.totalorder %v1277_v14, %v74_v15 }
  0x83   :  { %vm884_vm3 = vmpackc.low %vm76_vm2, %vm75_vm1 }
  0x84   :  { %973 = vmatmul.mubr.msk.bf16.vlgmr.msra.gmra.mxu0 %vm884_vm3, %v1151_v16 }
  0x85   :  { %1008 = vmatprep.mubr.msk.bf16.mxu0 %vm1150_vm0, %v1149_v2 }
 0x144   :  { %v1291_v19 = vpop.f32.mrf.mxu0 }
 0x146   :  { %v974_v20 = vpop.f32.mrf.mxu0 }
 0x148   :  { %v1293_v21 = vpop.f32.mrf.mxu0 }
 0x149   :  { %v187_v23 = vpack.c.bf16 %v1293_v21, %v1291_v19 }
 0x14a   :  { %v975_v24 = vpop.f32.mrf.mxu0 }
 0x14b   :  { %981 = vmatmul.mubr.msk.bf16.vlgmr.msra.gmra.mxu1 %vm204_vm4, %v187_v23 }
 0x14c   :  { %985 = vmatpush3.bf16.msra.mxu1 %v1068_v22  ;;  %988 = vmatprep.mubr.msk.bf16.mxu1 %vm1150_vm0, %v1149_v2  ;;  %v1072_v22 = vld [vmem:[%s1441_s9 + $0x8] sm:$0xff]  }
 0x14d   :  { %986 = vmatprep.subr.bf16.mxu1 %v1149_v2 }
 0x150   :  { %987 = vmatpush3.bf16.msra.mxu1 %v1069_v25 }
 0x151   :  { %992 = vmatprep.subr.bf16.mxu1 %v1149_v2 }
 0x153   :  { %989 = vmatmul.mubr.msk.bf16.vlgmr.msra.gmra.mxu1 %vm204_vm4, %v187_v23 }
 0x154   :  { %993 = vmatpush3.bf16.msra.mxu1 %v1070_v26  ;;  %996 = vmatprep.mubr.msk.bf16.mxu1 %vm1150_vm0, %v1149_v2 }
 0x155   :  { %994 = vmatprep.subr.bf16.mxu1 %v1149_v2 }
 0x158   :  { %995 = vmatpush3.bf16.msra.mxu1 %v1071_v27 }
 0x159   :  { %1000 = vmatprep.subr.bf16.mxu1 %v1149_v2 }
 0x15b   :  { %997 = vmatmul.mubr.msk.bf16.vlgmr.msra.gmra.mxu1 %vm204_vm4, %v187_v23  ;;  %v1073_v23 = vld [vmem:[%s1441_s9] sm:$0xff]  }
 0x15c   :  { %1002 = vmatprep.mubr.msk.bf16.mxu1 %vm1150_vm0, %v1149_v2 }
 0x20b   :  { %v242_v28 = vpop.f32.mrf.mxu1 }
 0x20d   :  { %v982_v29 = vpop.f32.mrf.mxu1 }
 0x20e   :  { %v1074_v29 = vld [vmem:[%s1442_s10 + $0x8] sm:$0xff]  }
 0x20f   :  { %v245_v30 = vpop.f32.mrf.mxu1 }
 0x210   :  { %v363_v41 = vpack.c.bf16 %v245_v30, %v242_v28  ;;  %v1075_v30 = vld [vmem:[%s1442_s10] sm:$0xff]  }
 0x211   :  { %v983_v31 = vpop.f32.mrf.mxu1 }
 0x213   :  { %v299_v32 = vpop.f32.mrf.mxu1 }
 0x215   :  { %v990_v33 = vpop.f32.mrf.mxu1 }
 0x217   :  { %v302_v34 = vpop.f32.mrf.mxu1 }
 0x218   :  { %v364_v35 = vpack.c.bf16 %v302_v34, %v299_v32 }
 0x219   :  { %v991_v36 = vpop.f32.mrf.mxu1 }
 0x21a   :  { %v369_v37 = vsel %vm204_vm4, %v364_v35, 0 }
 0x21b   :  { %v356_v38 = vpop.f32.mrf.mxu1  ;;  %1001 = vmatpush3.bf16.xpose.msra.mxu1 %v369_v37 }
 0x21c   :  { %1012 = vmatprep.subr.bf16.mxu1 %v1149_v2 }
 0x21d   :  { %v998_v39 = vpop.f32.mrf.mxu1 }
 0x21e   :  { %v1079_v39 = vld [vmem:[%s1443_s11] sm:$0xff]  }
 0x21f   :  { %v359_v40 = vpop.f32.mrf.mxu1 }
 0x220   :  { %v442_v42 = vpack.c.bf16 %v359_v40, %v356_v38  ;;  %v1076_v38 = vld [vmem:[%s1443_s11 + $0x18] sm:$0xff]  }
 0x221   :  { %v999_v43 = vpop.f32.mrf.mxu1 }
 0x222   :  { %1003 = vmatmul.mubr.msk.bf16.vlgmr.msra.gmra.mxu1 %vm204_vm4, %v363_v41  ;;  %1007 = vmatpush3.bf16.msra.mxu0 %v442_v42 }
 0x223   :  { %1016 = vmatprep.mubr.msk.bf16.mxu1 %vm1150_vm0, %v1149_v2  ;;  %1020 = vmatprep.subr.bf16.mxu0 %v1149_v2 }
 0x224   :  { %1013 = vmatpush3.bf16.msra.mxu1 %v1072_v22 }
 0x225   :  { %1014 = vmatprep.subr.bf16.mxu1 %v1149_v2 }
 0x228   :  { %1015 = vmatpush3.bf16.msra.mxu1 %v1073_v23 }
 0x229   :  { %1028 = vmatprep.subr.bf16.mxu1 %v1149_v2 }
 0x2e2   :  { %v405_v52 = vpop.f32.mrf.mxu1 }
 0x2e3   :  { %v412_v53 = vsel %vm1338_vm8, %v405_v52, -1e+30 }
 0x2e4   :  { %v1004_v54 = vpop.f32.mrf.mxu1  ;;  %v415_v55 = vsel %vm414_vm9, %v412_v53, -inf }
 0x2e5   :  { %416 = vmax.xlane.f32.xlu1 %v415_v55 }
 0x2e6   :  { %v408_v57 = vpop.f32.mrf.mxu1 }
 0x2e7   :  { %v413_v58 = vsel %vm1345_vm11, %v408_v57, -1e+30 }
 0x2e8   :  { %v1005_v59 = vpop.f32.mrf.mxu1  ;;  %v418_v60 = vsel %vm414_vm9, %v413_v58, -inf }
 0x2e9   :  { %419 = vmax.xlane.f32.xlu1 %v418_v60 }
 0x36e   :  { %v417_v61 = vpop.xlane.xlu1 %416 }
 0x36f   :  { %v421_v62 = vsub.f32 %v412_v53, %v417_v61 }
 0x371   :  { %v423_v63 = vmul.f32 1.442695, %v421_v62 }
 0x372   :  { %v420_v0 = vpop.xlane.xlu1 %419 }
 0x373   :  { %1082 = vpow2.f32 %v423_v63  ;;  %v422_v1 = vsub.f32 %v413_v58, %v420_v0  ;;  %v1080_v63 = vld [vmem:[%s1444_s12 + $0x8] sm:$0xff]   ;;  %v1081_v0 = vld [vmem:[%s1444_s12] sm:$0xff]  }
 0x375   :  { %v425_v3 = vmul.f32 1.442695, %v422_v1 }
 0x377   :  { %1084 = vpow2.f32 %v425_v3 }
 0x380   :  { %v1083_v4 = vpop.eup %1082 }
 0x381   :  { %v427_v5 = vsel %vm1338_vm8, %v1083_v4, 0.0 }
 0x382   :  { %v429_v6 = vsel %vm414_vm9, %v427_v5, 0.0 }
 0x383   :  { %430 = vadd.xlane.f32.xlu0 %v429_v6 }
 0x384   :  { %v1085_v7 = vpop.eup %1084 }
 0x385   :  { %v428_v8 = vsel %vm1345_vm11, %v1085_v7, 0.0 }
 0x386   :  { %v432_v9 = vsel %vm414_vm9, %v428_v8, 0.0 }
 0x387   :  { %433 = vadd.xlane.f32.xlu1 %v432_v9 }
 0x40c   :  { %v431_v10 = vpop.xlane.xlu0 %430 }
 0x40d   :  { %v435_v11 = vmax.f32 %v431_v10, 1.0 }
 0x40f   :  { %1086 = vrcp.f32 %v435_v11 }
 0x410   :  { %v434_v12 = vpop.xlane.xlu1 %433 }
 0x411   :  { %v436_v13 = vmax.f32 %v434_v12, 1.0 }
 0x413   :  { %1088 = vrcp.f32 %v436_v13  ;;  %v51_v13 = vld [vmem:[%s1433_s1] sm:$0xff] }
 0x41c   :  { %v1087_v15 = vpop.eup %1086 }
 0x41d   :  { %v439_v17 = vmul.f32 %v1087_v15, %v427_v5  ;;  %v52_v15 = vld [vmem:[%s1433_s1 + $0x8] sm:$0xff]  ;;  %s1152_s1 = smov [#allocation2]  }
 0x41e   :  { %s849_s26 = sshll.u32 %s1152_s1, 4  ;;  %s850_s26 = int_to_ptr.vmem [resolvable:$true] %s849_s26 }
 0x41f   :  { %s1104_s27 = scalar_lea.vmem %s850_s26, 128  ;;  %p1109_p1 = scmp.lt.s32.totalorder %s850_s26, %s850_s26 }
 0x420   :  { %v1089_v16 = vpop.eup %1088  ;;  %p1105_p0 = scmp.ne.s32.totalorder %s850_s26, %s1104_s27  ;;  %p1110_p2 = scmp.lt.s32.totalorder %s1104_s27, %s1104_s27 }
 0x421   :  { %v440_v18 = vmul.f32 %v1089_v16, %v428_v8 }
 0x422   :  { %p1111_p3 = por %p1110_p2, %p1109_p1 }
 0x423   :  { %v441_v20 = vpack.c.bf16 %v440_v18, %v439_v17 }
 0x424   :  { %p1112_p4 = pnand %p1111_p3, %p1105_p0 }
 0x425   :  { %1009 = vmatmul.mubr.msk.bf16.vlgmr.msra.gmra.mxu0 %vm414_vm9, %v441_v20 }
 0x426   :  { %1024 = vmatprep.mubr.msk.bf16.mxu0 %vm1150_vm0, %v1149_v2  ;;  %1021 = vmatpush3.bf16.msra.mxu0 %v1074_v29 }
 0x427   :  { %1022 = vmatprep.subr.bf16.mxu0 %v1149_v2 }
 0x42a   :  { %1023 = vmatpush3.bf16.msra.mxu0 %v1075_v30 }
 0x42b   :  { %1040 = vmatprep.subr.bf16.mxu0 %v1149_v2 }
 0x4e5   :  { %v480_v24 = vpop.f32.mrf.mxu0 }
 0x4e7   :  { %v1010_v25 = vpop.f32.mrf.mxu0 }
 0x4e9   :  { %v483_v26 = vpop.f32.mrf.mxu0 }
 0x4ea   :  { %v487_v27 = vpack.c.bf16 %v483_v26, %v480_v24 }
 0x4eb   :  { %v1011_v28 = vpop.f32.mrf.mxu0 }
 0x4ec   :  { %1017 = vmatmul.mubr.msk.bf16.vlgmr.msra.gmra.mxu1 %vm204_vm4, %v487_v27 }
 0x4ed   :  { %1036 = vmatprep.mubr.msk.bf16.mxu1 %vm1150_vm0, %v1149_v2  ;;  %1029 = vmatpush3.bf16.msra.mxu1 %v1076_v38 }
 0x4ee   :  { %1030 = vmatprep.subr.bf16.mxu1 %v1149_v2 }
 0x5ac   :  { %v541_v31 = vpop.f32.mrf.mxu1 }
 0x5ad   :  { %v548_v34 = vadd.f32 %v541_v31, %v1291_v19  ;;  %v1077_v19 = vld [vmem:[%s1443_s11 + $0x10] sm:$0xff]  }
 0x5ae   :  { %v1018_v32 = vpop.f32.mrf.mxu1  ;;  %1031 = vmatpush3.bf16.msra.mxu1 %v1077_v19 }
 0x5af   :  { %1032 = vmatprep.subr.bf16.mxu1 %v1149_v2 }
 0x5b0   :  { %v544_v33 = vpop.f32.mrf.mxu1 }
 0x5b1   :  { %v549_v35 = vadd.f32 %v544_v33, %v1293_v21  ;;  %v1078_v21 = vld [vmem:[%s1443_s11 + $0x8] sm:$0xff]  }
 0x5b2   :  { %v1019_v36 = vpop.f32.mrf.mxu1  ;;  %1033 = vmatpush3.bf16.msra.mxu1 %v1078_v21 }
 0x5b3   :  { %v550_v37 = vpack.c.bf16 %v549_v35, %v548_v34  ;;  %1034 = vmatprep.subr.bf16.mxu1 %v1149_v2 }
 0x5b5   :  { %1025 = vmatmul.mubr.msk.bf16.vlgmr.msra.gmra.mxu0 %vm204_vm4, %v550_v37 }
 0x5b6   :  { %1044 = vmatprep.mubr.msk.bf16.mxu0 %vm1150_vm0, %v1149_v2  ;;  %1035 = vmatpush3.bf16.msra.mxu1 %v1079_v39 }
 0x5b7   :  { %1041 = vmatpush3.bf16.msra.mxu0 %v1080_v63 }
 0x5b8   :  { %1042 = vmatprep.subr.bf16.mxu0 %v1149_v2 }
 0x5bb   :  { %1043 = vmatpush3.bf16.msra.mxu0 %v1081_v0 }
 0x675   :  { %v604_v40 = vpop.f32.mrf.mxu0 }
 0x676   :  { %v613_v41 = vmul.f32 0.044715, %v604_v40  ;;  %v611_v57 = vmul.f32 0.5, %v604_v40 }
 0x677   :  { %v1026_v42 = vpop.f32.mrf.mxu0 }
 0x678   :  { %v615_v43 = vmul.f32 %v613_v41, %v604_v40 }
 0x679   :  { %v607_v44 = vpop.f32.mrf.mxu0 }
 0x67a   :  { %v617_v45 = vmul.f32 %v615_v43, %v604_v40  ;;  %v614_v46 = vmul.f32 0.044715, %v607_v44  ;;  %v612_v58 = vmul.f32 0.5, %v607_v44 }
 0x67b   :  { %v1027_v47 = vpop.f32.mrf.mxu0 }
 0x67c   :  { %v619_v48 = vadd.f32 %v617_v45, %v604_v40  ;;  %v616_v49 = vmul.f32 %v614_v46, %v607_v44 }
 0x67e   :  { %v621_v50 = vmul.f32 0.7978846, %v619_v48  ;;  %v618_v51 = vmul.f32 %v616_v49, %v607_v44 }
 0x680   :  { %1090 = vtanh.f32 %v621_v50  ;;  %v620_v52 = vadd.f32 %v618_v51, %v607_v44 }
 0x682   :  { %v622_v53 = vmul.f32 0.7978846, %v620_v52 }
 0x684   :  { %1092 = vtanh.f32 %v622_v53 }
 0x68d   :  { %v1091_v54 = vpop.eup %1090 }
 0x68e   :  { %v625_v55 = vadd.f32 1.0, %v1091_v54 }
 0x690   :  { %v627_v60 = vmul.f32 %v625_v55, %v611_v57 }
 0x691   :  { %v1093_v56 = vpop.eup %1092 }
 0x692   :  { %v626_v59 = vadd.f32 1.0, %v1093_v56 }
 0x694   :  { %v628_v61 = vmul.f32 %v626_v59, %v612_v58 }
 0x696   :  { %v629_v62 = vpack.c.bf16 %v628_v61, %v627_v60 }
 0x698   :  { %1037 = vmatmul.mubr.msk.bf16.vlgmr.msra.gmra.mxu1 %vm662_vm12, %v629_v62 }
 0x758   :  { %v700_v1 = vpop.f32.mrf.mxu1 }
 0x759   :  { %v707_v5 = vadd.f32 %v700_v1, %v548_v34 }
 0x75a   :  { %v1038_v3 = vpop.f32.mrf.mxu1 }
 0x75c   :  { %v703_v4 = vpop.f32.mrf.mxu1 }
 0x75d   :  { %v708_v6 = vadd.f32 %v703_v4, %v549_v35 }
 0x75e   :  { %v1039_v7 = vpop.f32.mrf.mxu1 }
 0x75f   :  { %v709_v8 = vpack.c.bf16 %v708_v6, %v707_v5 }
 0x761   :  { %1045 = vmatmul.mubr.msk.bf16.vlgmr.msra.gmra.mxu0 %vm204_vm4, %v709_v8 }
 0x821   :  { %v763_v9 = vpop.f32.mrf.mxu0 }
 0x822   :  { %780 = vmax.xlane.f32.xlu1 %v763_v9 }
 0x823   :  { %v1046_v10 = vpop.f32.mrf.mxu0 }
 0x825   :  { %v766_v11 = vpop.f32.mrf.mxu0 }
 0x826   :  { %782 = vmax.xlane.f32.xlu1 %v766_v11  ;;  %v918_v2 = vpack.c.bf16 %v766_v11, %v763_v9 }
 0x827   :  { %v1047_v12 = vpop.f32.mrf.mxu0 }
 0x828   :  { %919 = vst [vmem:[#allocation2] sm:$0xff] %v918_v2  }
 0x837   :  { %801 = vperm.xlu1 %1057, %v51_v13  }
 0x83b   :  { %804 = vperm.xlu1 %1057, %v52_v15  }
 0x8ab   :  { %v781_v16 = vpop.xlane.xlu1 %780 }
 0x8ac   :  { %v784_v17 = vsub.f32 %v763_v9, %v781_v16 }
 0x8ae   :  { %v786_v18 = vmul.f32 1.442695, %v784_v17 }
 0x8af   :  { %v783_v20 = vpop.xlane.xlu1 %782 }
 0x8b0   :  { %1094 = vpow2.f32 %v786_v18  ;;  %v785_v22 = vsub.f32 %v766_v11, %v783_v20 }
 0x8b2   :  { %v788_v23 = vmul.f32 1.442695, %v785_v22 }
 0x8b3   :  { %v802_v24 = vpop.permute.xlu1 %801 }
 0x8b4   :  { %1096 = vpow2.f32 %v788_v23  ;;  %vm806_vm13 = vcmp.eq.s32.totalorder %v1277_v14, %v802_v24 }
 0x8b5   :  { %v808_v28 = vsel %vm806_vm13, %v763_v9, 0.0 }
 0x8b7   :  { %v805_v26 = vpop.permute.xlu1 %804 }
 0x8b8   :  { %vm807_vm14 = vcmp.eq.s32.totalorder %v1277_v14, %v805_v26 }
 0x8b9   :  { %v809_v29 = vsel %vm807_vm14, %v766_v11, 0.0 }
 0x8bd   :  { %v1095_v25 = vpop.eup %1094 }
 0x8be   :  { %790 = vadd.xlane.f32.xlu0 %v1095_v25 }
 0x8c1   :  { %v1097_v27 = vpop.eup %1096 }
 0x8c2   :  { %792 = vadd.xlane.f32.xlu1 %v1097_v27  ;;  %810 = vadd.xlane.f32.xlu0 %v808_v28 }
 0x8c6   :  { %812 = vadd.xlane.f32.xlu0 %v809_v29 }
 0x8c7   :  { %1115 = shalt.err (!%p1112_p4)
}
 0x8c8   :  { %s1153_s28 = smov 64   ;;  %s1154_s3 = smov 4   ;;  %v816_v14 = vld [vmem:[%s1434_s2] sm:$0xff]  ;;  %vm820_vm15 = vcmask 7168   ;;  %v817_v30 = vld [vmem:[%s1434_s2 + $0x8] sm:$0xff]  ;;  %vm842_vm0 = vcmask 0  }
 0x8c9   :  { %855 = dma.vmem_to_hbm [thread:$0]  %s850_s26, 128, %s1445_s13, [#allocation3], %s1153_s28, %s1153_s28, %s1154_s3   ;;  %v830_v31 = vsel %vm820_vm15, %v816_v14, 0.0  ;;  %v831_v32 = vsel %vm820_vm15, %v817_v30, 0.0 }
 0x8ca   :  { %v832_v33 = vadd.f32 %v831_v32, %v830_v31  ;;  %s1155_s2 = smov [#allocation4]  }
 0x8cb   :  { %s862_s13 = sshll.u32 %s1155_s2, 4  ;;  %s863_s13 = int_to_ptr.vmem [resolvable:$true] %s862_s13 }
 0x8cc   :  { %v833_v34 = vrot.slane %v832_v33, 4  ;;  %s1124_s16 = scalar_lea.vmem %s863_s13, 16  ;;  %s1128_s17 = scalar_lea.vmem %s863_s13, 32 }
 0x8cd   :  { %p1125_p5 = scmp.ne.s32.totalorder %s863_s13, %s1124_s16  ;;  %p1129_p6 = scmp.lt.s32.totalorder %s863_s13, %s863_s13 }
 0x8ce   :  { %v834_v36 = vadd.f32 %v833_v34, %v832_v33  ;;  %p1130_p7 = scmp.lt.s32.totalorder %s1128_s17, %s1124_s16 }
 0x8d0   :  { %v835_v38 = vrot.slane %v834_v36, 2  ;;  %p1131_p8 = por %p1130_p7, %p1129_p6 }
 0x8d2   :  { %v836_v19 = vadd.f32 %v835_v38, %v834_v36  ;;  %p1132_p9 = pnand %p1131_p8, %p1125_p5 }
 0x8d4   :  { %v837_v39 = vrot.slane %v836_v19, 1 }
 0x8d6   :  { %v838_v44 = vadd.f32 %v837_v39, %v836_v19 }
 0x8d8   :  { %v839_v48 = vmax.f32 %v838_v44, 1.0 }
 0x947   :  { %v791_v35 = vpop.xlane.xlu0 %790 }
 0x948   :  { %1098 = vlog2.f32 %v791_v35 }
 0x94b   :  { %v793_v37 = vpop.xlane.xlu1 %792  ;;  %v811_v41 = vpop.xlane.xlu0 %810 }
 0x94c   :  { %1100 = vlog2.f32 %v793_v37 }
 0x94d   :  { %1102 = vrcp.f32 %v839_v48 }
 0x94f   :  { %v813_v49 = vpop.xlane.xlu0 %812 }
 0x955   :  { %v1099_v21 = vpop.eup %1098 }
 0x956   :  { %v795_v40 = vmul.f32 0.6931472, %v1099_v21 }
 0x958   :  { %v798_v42 = vadd.f32 %v795_v40, %v781_v16 }
 0x959   :  { %v1101_v43 = vpop.eup %1100 }
 0x95a   :  { %v814_v45 = vsub.f32 %v798_v42, %v811_v41  ;;  %v797_v46 = vmul.f32 0.6931472, %v1101_v43  ;;  %v1103_v61 = vpop.eup %1102 }
 0x95c   :  { %v799_v47 = vadd.f32 %v797_v46, %v783_v20  ;;  %v818_v50 = vmul.f32 %v816_v14, %v814_v45 }
 0x95e   :  { %v815_v51 = vsub.f32 %v799_v47, %v813_v49  ;;  %v821_v53 = vsel %vm820_vm15, %v818_v50, 0.0 }
 0x960   :  { %v819_v52 = vmul.f32 %v817_v30, %v815_v51 }
 0x962   :  { %v822_v54 = vsel %vm820_vm15, %v819_v52, 0.0 }
 0x963   :  { %v823_v55 = vadd.f32 %v822_v54, %v821_v53 }
 0x965   :  { %v824_v56 = vrot.slane %v823_v55, 4 }
 0x967   :  { %v825_v57 = vadd.f32 %v824_v56, %v823_v55 }
 0x969   :  { %v826_v58 = vrot.slane %v825_v57, 2 }
 0x96b   :  { %v827_v59 = vadd.f32 %v826_v58, %v825_v57 }
 0x96d   :  { %v828_v60 = vrot.slane %v827_v59, 1 }
 0x96f   :  { %v829_v62 = vadd.f32 %v828_v60, %v827_v59 }
 0x971   :  { %v841_v63 = vmul.f32 %v1103_v61, %v829_v62 }
 0x973   :  { %843 = vst.msk [vmem:[#allocation4] sm:$0x1] %vm842_vm0, %v841_v63 }
 0x974   :  { %1135 = shalt.err (!%p1132_p9)
}
 0x975   :  { %865 = dma.vmem_to_hbm [thread:$0]  %s863_s13, 16, %s1446_s14, [#allocation5]  }
 0x976   :  { %1144 = dma.done.wait [#allocation3], 128  }
 0x977   :  { %1145 = vsyncadd [#allocation3], 4294967168 }
 0x978   :  { %1146 = dma.done.wait [#allocation5], 16  }
 0x979   :  { %1147 = vsyncadd [#allocation5], 4294967280 }
 0x97a   :  { %872 = vsyncpa [#allocation3], 1 }
 0x97b   :  { %873 = vsyncpa [#allocation5], 1 }

</bundles_post_ra>
